<compile_context>
chip_gen: v6e
topology: v6e:2x2x1
jax: 0.10.0
libtpu: 0.0.40
codegen_flags: <defaults>
</compile_context>

<pallas_src>
import jax
import jax.numpy as jnp
from jax import lax
from jax.experimental import pallas as pl
from jax.experimental.pallas import tpu as pltpu

BN_EPS = 1e-5


# --------------------------- Pallas kernels ---------------------------------

def _make_matmul_stats_kernel(tm, m_phase, needs_mask):
    """Pass 1: y = W @ patches for one (phase, M-tile).  Writes the raw y tile
    (lane-dense, bf16) and a per-tile (C_out, 2) block of [mean, M2] computed
    over the VALID columns only (padded columns masked out)."""

    def kernel(w_ref, p_ref, y_ref, stat_ref):
        y = jnp.dot(w_ref[0], p_ref[0],
                    preferred_element_type=jnp.float32)        # (C_out, TM) f32
        y_ref[0, :, :] = y.astype(y_ref.dtype)                 # cache y (bf16)

        if needs_mask:
            t = pl.program_id(1)
            valid = jnp.minimum(tm, m_phase - t * tm)          # valid cols in tile
            # padded columns of y are exactly 0 (W @ 0), so the plain sum is
            # already the sum over valid columns.
            mean = jnp.sum(y, axis=1, keepdims=True) / valid.astype(jnp.float32)
            col = lax.broadcasted_iota(jnp.int32, y.shape, 1)
            c = jnp.where(col < valid, y - mean, 0.0)
        else:
            mean = jnp.sum(y, axis=1, keepdims=True) * jnp.float32(1.0 / tm)
            c = y - mean
        m2 = jnp.sum(c * c, axis=1, keepdims=True)             # (C_out, 1)
        stat_ref[0, 0, :, :] = jnp.concatenate([mean, m2], axis=1)   # (C_out, 2)

    return kernel


def _norm_relu_kernel(y_ref, scale_ref, shift_ref, o_ref):
    """Pass 2: elementwise folded BN (one FMA) + ReLU over the cached y tile;
    output aliases the y buffer (in-place update)."""
    y = y_ref[0, :, :].astype(jnp.float32)
    o_ref[0, :, :] = jnp.maximum(y * scale_ref[...] + shift_ref[...],
                                 0.0).astype(o_ref.dtype)


# --------------------------- wrapper glue ------------------------------------

def _vmem_budget():
    """Working-set budget + physical VMEM capacity (per TensorCore)."""
    cap = 128 * 1024 * 1024
    try:
        info = pltpu.get_tpu_info()
        cap = int(getattr(info, "vmem_capacity_bytes", cap))
    except Exception:
        pass
    # ~48 MiB on 128 MiB chips (v5e/v6e), ~38 MiB on 64 MiB v7x.
    budget = max(8 << 20, min(int(0.6 * cap), 48 << 20))
    return budget, cap


def _select_tile_m(m_phase, k_dim, c_out, n_phase, op_bytes, budget):
    """Largest lane-dense M tile whose double-buffered working set (including
    the in-kernel f32 temporaries) fits the budget; pads M up to a tile
    multiple and keeps an even (>=2) number of parallel grid steps."""
    m128 = -(-m_phase // 128) * 128
    tm = 128
    for cand in (4096, 2048, 1024, 512, 256, 128):
        work = (2 * cand * k_dim * op_bytes        # patch tile, double-buffered
                + 2 * c_out * k_dim * op_bytes     # weight tile, double-buffered
                + 2 * c_out * cand * op_bytes      # y output tile, double-buffered
                + 3 * c_out * cand * 4)            # f32 temps (y, centered, mask)
        if work <= budget:
            tm = cand
            break
    tm = min(tm, m128)
    n_tiles = -(-m_phase // tm)
    # v7x has 2 TensorCores: prefer an even number of parallel grid steps.
    while (n_phase * n_tiles) % 2 == 1 and tm >= 256 and tm % 256 == 0:
        tm //= 2
        n_tiles = -(-m_phase // tm)
    m_pad = n_tiles * tm
    return tm, m_pad, n_tiles


def _phase_patches(x, weight, k, s, padding):
    """Sub-pixel (phase) decomposition of ConvTranspose2d: s*s compact stride-1
    im2col problems on the ORIGINAL x (no zero insertion, no kernel flip).
    Requires k % s == 0 and (k - 2*padding) % s == 0 (uniform phases)."""
    N, C_in, H, W = x.shape
    C_out = weight.shape[1]
    Ho = (H - 1) * s - 2 * padding + k
    Wo = (W - 1) * s - 2 * padding + k
    n_tap = k // s
    Qh, Qw = Ho // s, Wo // s
    K_phase = C_in * n_tap * n_tap
    M_phase = N * Qh * Qw

    patches, weights = [], []
    for rh in range(s):
        kh0 = (rh + padding) % s
        a_h = (rh + padding) // s
        pad_t = max(0, n_tap - 1 - a_h)
        pad_b = max(0, (Qh - 1 + a_h) - (H - 1))
        for rw in range(s):
            kw0 = (rw + padding) % s
            a_w = (rw + padding) // s
            pad_l = max(0, n_tap - 1 - a_w)
            pad_r = max(0, (Qw - 1 + a_w) - (W - 1))
            xp = jnp.pad(x, ((0, 0), (0, 0), (pad_t, pad_b), (pad_l, pad_r)))
            taps = []
            for jh in range(n_tap):            # tap j  <->  kernel index kh0 + j*s
                h0 = pad_t + a_h - jh
                for jw in range(n_tap):
                    w0 = pad_l + a_w - jw
                    taps.append(xp[:, :, h0:h0 + Qh, w0:w0 + Qw])   # (N, C_in, Qh, Qw)
            ph = jnp.stack(taps, axis=0)                            # (T, N, C_in, Qh, Qw)
            ph = ph.transpose(2, 0, 1, 3, 4).reshape(K_phase, M_phase)
            patches.append(ph)
            wsub = weight[:, :, kh0::s, kw0::s]                     # (C_in, C_out, nt, nt)
            weights.append(wsub.transpose(1, 0, 2, 3).reshape(C_out, K_phase))
    return (jnp.stack(patches, axis=0),        # (s*s, K_phase, M_phase)
            jnp.stack(weights, axis=0),        # (s*s, C_out, K_phase)
            s * s, Qh, Qw)


def _zero_insert_patches(x, weight, k, s, padding):
    """Fallback (non-uniform phases): zero-insertion upsample + flipped-kernel
    correlation im2col, laid out directly as (1, K, M)."""
    N, C_in, H, W = x.shape
    C_out = weight.shape[1]
    p_eff = k - 1 - padding
    assert p_eff >= 0, "padding must satisfy padding <= k_size - 1"
    Hd, Wd = (H - 1) * s + 1, (W - 1) * s + 1
    x_up = jnp.zeros((N, C_in, Hd, Wd), x.dtype).at[:, :, ::s, ::s].set(x)
    x_pad = jnp.pad(x_up, ((0, 0), (0, 0), (p_eff, p_eff), (p_eff, p_eff)))
    Ho, Wo = Hd + 2 * p_eff - k + 1, Wd + 2 * p_eff - k + 1
    cols = [x_pad[:, :, kh:kh + Ho, kw:kw + Wo] for kh in range(k) for kw in range(k)]
    pt = jnp.stack(cols, axis=0).reshape(k, k, N, C_in, Ho, Wo)
    pt = pt.transpose(3, 0, 1, 2, 4, 5).reshape(1, C_in * k * k, N * Ho * Wo)
    w = weight[:, :, ::-1, ::-1].transpose(1, 0, 2, 3).reshape(1, C_out, C_in * k * k)
    return pt, w


def deconv2d_batchnorm_relu(x, weight, bias, gamma, beta, *, k_size, stride, padding,
                            operand_dtype=jnp.bfloat16, out_dtype=jnp.bfloat16):
    """x: (N, C_in, H, W) NCHW.  weight: (C_in, C_out, k, k) (PyTorch ConvTranspose2d).
    Returns (N, C_out, H_out, W_out) NCHW in `out_dtype`."""
    del bias  # exactly cancelled by train-mode BatchNorm's mean subtraction
    N, C_in, H, W = x.shape
    C_out = weight.shape[1]
    k, s = k_size, stride
    Ho = (H - 1) * s - 2 * padding + k
    Wo = (W - 1) * s - 2 * padding + k

    # Build patches directly in the matmul operand dtype (no f32 intermediate).
    x = x.astype(operand_dtype)
    weight_op = weight.astype(operand_dtype)

    use_phase = (k % s == 0) and ((k - 2 * padding) % s == 0)
    if use_phase:
        patchesT, w_all, n_phase, Qh, Qw = _phase_patches(x, weight_op, k, s, padding)
    else:
        # TODO(synk): the zero-insertion fallback still materializes a full im2col;
        # replace with an in-kernel tap gather for production-size non-uniform-phase deconvs.
        patchesT, w_all = _zero_insert_patches(x, weight_op, k, s, padding)
        n_phase, Qh, Qw = 1, Ho, Wo

    _, K_dim, M_phase = patchesT.shape
    op_bytes = jnp.dtype(operand_dtype).itemsize
    budget, vmem_cap = _vmem_budget()
    TM, M_pad, n_tiles = _select_tile_m(M_phase, K_dim, C_out, n_phase, op_bytes, budget)
    needs_mask = (M_pad != M_phase)
    if needs_mask:
        patchesT = jnp.pad(patchesT, ((0, 0), (0, 0), (0, M_pad - M_phase)))
    grid = (n_phase, n_tiles)

    vmem_limit = int(max(16 << 20, min(vmem_cap - (4 << 20), budget + (16 << 20))))
    params = pltpu.CompilerParams(
        dimension_semantics=("parallel", "parallel"),
        vmem_limit_bytes=vmem_limit)

    w_spec = pl.BlockSpec((1, C_out, K_dim), lambda ph, t: (ph, 0, 0))
    p_spec = pl.BlockSpec((1, K_dim, TM), lambda ph, t: (ph, 0, t))
    y_spec = pl.BlockSpec((1, C_out, TM), lambda ph, t: (ph, 0, t))
    stat_spec = pl.BlockSpec((1, 1, C_out, 2), lambda ph, t: (ph, t, 0, 0))

    # ------------- pass 1: matmul + per-tile centered BN stats, y cached -----
    y_all, stats = pl.pallas_call(
        _make_matmul_stats_kernel(TM, M_phase, needs_mask),
        out_shape=(jax.ShapeDtypeStruct((n_phase, C_out, M_pad), operand_dtype),
                   jax.ShapeDtypeStruct((n_phase, n_tiles, C_out, 2), jnp.float32)),
        grid_spec=pltpu.PrefetchScalarGridSpec(
            num_scalar_prefetch=0, grid=grid,
            in_specs=[w_spec, p_spec],
            out_specs=(y_spec, stat_spec)),
        compiler_params=params,
    )(w_all, patchesT)

    # Weighted Chan parallel-variance combine (padded columns already excluded).
    counts = jnp.minimum(TM, M_phase - TM * jnp.arange(n_tiles)).astype(jnp.float32)
    wgt = counts[None, :, None]                               # (1, n_tiles, 1)
    total = float(n_phase * M_phase)
    means = stats[..., 0]                                     # (n_phase, n_tiles, C_out)
    m2s = stats[..., 1]
    gmean = jnp.sum(means * wgt, axis=(0, 1)) / total         # (C_out,)
    m2_tot = jnp.sum(m2s, axis=(0, 1)) + jnp.sum(wgt * (means - gmean) ** 2, axis=(0, 1))
    var = m2_tot / total                                      # biased (train-mode BN)
    inv_std = lax.rsqrt(var + BN_EPS)
    g32 = gamma.astype(jnp.float32)
    scale = (g32 * inv_std).reshape(C_out, 1)
    shift = (beta.astype(jnp.float32) - gmean * g32 * inv_std).reshape(C_out, 1)

    # ------------- pass 2: folded BN FMA + ReLU, in place on cached y --------
    sc_spec = pl.BlockSpec((C_out, 1), lambda ph, t: (0, 0))
    alias = {0: 0} if jnp.dtype(out_dtype) == jnp.dtype(operand_dtype) else {}
    y_norm = pl.pallas_call(
        _norm_relu_kernel,
        out_shape=jax.ShapeDtypeStruct((n_phase, C_out, M_pad), out_dtype),
        grid_spec=pltpu.PrefetchScalarGridSpec(
            num_scalar_prefetch=0, grid=grid,
            in_specs=[y_spec, sc_spec, sc_spec],
            out_specs=y_spec),
        input_output_aliases=alias,
        compiler_params=params,
    )(y_all, scale, shift)

    # ------------- reassemble to NCHW (PyTorch layout parity) ----------------
    # TODO(synk): fuse/skip this phase-interleave transpose for channels-last consumers.
    y_norm = y_norm[:, :, :M_phase]
    if use_phase:
        out = y_norm.reshape(s, s, C_out, N, Qh, Qw)
        out = out.transpose(3, 2, 4, 0, 5, 1).reshape(N, C_out, Ho, Wo)
    else:
        out = y_norm.reshape(C_out, N, Ho, Wo).transpose(1, 0, 2, 3)
    return out


# --------------------------- pure-JAX reference ------------------------------

def _reference(x, weight, bias, gamma, beta, *, k_size, stride, padding):
    """Matches PyTorch ConvTranspose2d + BatchNorm2d(train) + ReLU."""
    k = k_size
    p_eff = k - 1 - padding
    w_conv = jnp.transpose(weight[:, :, ::-1, ::-1], (1, 0, 2, 3))  # (C_out, C_in, k, k)
    y = lax.conv_general_dilated(
        x.astype(jnp.float32), w_conv.astype(jnp.float32),
        window_strides=(1, 1),
        padding=[(p_eff, p_eff), (p_eff, p_eff)],
        lhs_dilation=(stride, stride),
        dimension_numbers=("NCHW", "OIHW", "NCHW"))
    y = y + bias[None, :, None, None]
    mean = jnp.mean(y, axis=(0, 2, 3), keepdims=True)
    var = jnp.mean((y - mean) ** 2, axis=(0, 2, 3), keepdims=True)  # biased
    yn = (y - mean) * lax.rsqrt(var + BN_EPS)
    yn = yn * gamma[None, :, None, None] + beta[None, :, None, None]
    return jnp.maximum(yn, 0.0)


# --------------------------- test driver --------------------------------------

if __name__ == "__main__":
    def _run_case(name, in_channels, n_filters, k_size, stride, padding, N, H, W):
        key = jax.random.PRNGKey(0)
        kx, kw, kb, kg, kbe = jax.random.split(key, 5)
        x = jax.random.normal(kx, (N, in_channels, H, W), dtype=jnp.float32)
        weight = 0.1 * jax.random.normal(kw, (in_channels, n_filters, k_size, k_size),
                                         dtype=jnp.float32)
        bias = 0.1 * jax.random.normal(kb, (n_filters,), dtype=jnp.float32)
        gamma = 1.0 + 0.1 * jax.random.normal(kg, (n_filters,), dtype=jnp.float32)
        beta = 0.1 * jax.random.normal(kbe, (n_filters,), dtype=jnp.float32)

        fn = jax.jit(lambda a, b, c, d, e: deconv2d_batchnorm_relu(
            a, b, c, d, e, k_size=k_size, stride=stride, padding=padding))
        out = jax.block_until_ready(fn(x, weight, bias, gamma, beta))
        ref = jax.block_until_ready(_reference(x, weight, bias, gamma, beta,
                                               k_size=k_size, stride=stride,
                                               padding=padding))
        Ho = (H - 1) * stride - 2 * padding + k_size
        Wo = (W - 1) * stride - 2 * padding + k_size
        assert out.shape == (N, n_filters, Ho, Wo), (name, out.shape)
        out32 = out.astype(jnp.float32)
        err = float(jnp.max(jnp.abs(out32 - ref)))
        # bf16 matmul operands / bf16 cached y & output vs f32 reference
        assert jnp.allclose(out32, ref, rtol=2.5e-2, atol=2.5e-2), (name, err)

    # Main config (sub-pixel/phase path): deconv2DBatchNormRelu(4, 8, k=4, s=2, p=1)
    _run_case("phase", 4, 8, 4, 2, 1, N=2, H=16, W=16)
    # Config exercising the zero-insertion fallback + masked-stats padding path
    _run_case("fallback", 4, 8, 3, 2, 1, N=2, H=8, W=8)

    print("KERNEL_OK")
</pallas_src>

<mosaic_0001>
module attributes {stable_mosaic.version = 11 : i64} {
  func.func @kernel(%arg0: i32, %arg1: i32, %arg2: memref<1x8x16xbf16, #tpu.memory_space<vmem>>, %arg3: memref<1x16x512xbf16, #tpu.memory_space<vmem>>, %arg4: memref<1x8x512xbf16, #tpu.memory_space<vmem>>, %arg5: memref<1x1x8x2xf32, #tpu.memory_space<vmem>>) attributes {dimension_semantics = [#tpu.dimension_semantics<parallel>, #tpu.dimension_semantics<parallel>], iteration_bounds = array<i64: 4, 1>, scalar_prefetch = 0 : i64, scratch_operands = 0 : i64, tpu.core_type = #tpu.core_type<tc>, window_params = [{transform_indices = @transform_0, window_bounds = array<i64: 1, 8, 16>}, {transform_indices = @transform_1, window_bounds = array<i64: 1, 16, 512>}, {transform_indices = @transform_2, window_bounds = array<i64: 1, 8, 512>}, {transform_indices = @transform_3, window_bounds = array<i64: 1, 1, 8, 2>}]} {
    %c0 = arith.constant 0 : index
    %c0_0 = arith.constant 0 : index
    %c0_1 = arith.constant 0 : index
    %0 = vector.load %arg2[%c0, %c0_0, %c0_1] : memref<1x8x16xbf16, #tpu.memory_space<vmem>>, vector<1x8x16xbf16>
    %1 = vector.shape_cast %0 : vector<1x8x16xbf16> to vector<8x16xbf16>
    %c0_2 = arith.constant 0 : index
    %c0_3 = arith.constant 0 : index
    %c0_4 = arith.constant 0 : index
    %2 = vector.load %arg3[%c0_2, %c0_3, %c0_4] : memref<1x16x512xbf16, #tpu.memory_space<vmem>>, vector<1x16x512xbf16>
    %3 = vector.shape_cast %2 : vector<1x16x512xbf16> to vector<16x512xbf16>
    %cst = arith.constant dense<0.000000e+00> : vector<8x512xf32>
    %4 = tpu.matmul %1, %3, %cst {dimension_numbers = #tpu.dot_dimension_numbers<[1], [0], [0], [1], [0, 0, 1, 1], [], []>} : vector<8x16xbf16>, vector<16x512xbf16>, vector<8x512xf32> -> vector<8x512xf32>
    %5 = arith.truncf %4 : vector<8x512xf32> to vector<8x512xbf16>
    %c0_5 = arith.constant 0 : index
    %c0_6 = arith.constant 0 : index
    %c0_7 = arith.constant 0 : index
    %6 = vector.load %arg4[%c0_5, %c0_6, %c0_7] : memref<1x8x512xbf16, #tpu.memory_space<vmem>>, vector<1x8x512xbf16>
    %7 = vector.shape_cast %6 : vector<1x8x512xbf16> to vector<8x512xbf16>
    %8 = vector.shape_cast %5 : vector<8x512xbf16> to vector<1x8x512xbf16>
    tpu.vector_store %arg4[%c0_5, %c0_6, %c0_7], %8 {strides = array<i32>} : memref<1x8x512xbf16, #tpu.memory_space<vmem>>, vector<1x8x512xbf16>,
    %cst_8 = arith.constant dense<0.000000e+00> : vector<8xf32>
    %9 = vector.multi_reduction <add>, %4, %cst_8 [1] : vector<8x512xf32> to vector<8xf32>
    %10 = vector.shape_cast %9 : vector<8xf32> to vector<8x1xf32>
    %cst_9 = arith.constant 0.001953125 : f32
    %11 = vector.broadcast %cst_9 : f32 to vector<8x1xf32>
    %12 = arith.mulf %10, %11 : vector<8x1xf32>
    %13 = vector.broadcast %12 : vector<8x1xf32> to vector<8x512xf32>
    %14 = arith.subf %4, %13 : vector<8x512xf32>
    %15 = arith.mulf %14, %14 : vector<8x512xf32>
    %cst_10 = arith.constant dense<0.000000e+00> : vector<8xf32>
    %16 = vector.multi_reduction <add>, %15, %cst_10 [1] : vector<8x512xf32> to vector<8xf32>
    %17 = vector.shape_cast %16 : vector<8xf32> to vector<8x1xf32>
    %18 = tpu.concatenate %12, %17 in 1 : vector<8x1xf32>, vector<8x1xf32> -> vector<8x2xf32>
    %c0_11 = arith.constant 0 : index
    %c0_12 = arith.constant 0 : index
    %c0_13 = arith.constant 0 : index
    %c0_14 = arith.constant 0 : index
    %19 = vector.load %arg5[%c0_11, %c0_12, %c0_13, %c0_14] : memref<1x1x8x2xf32, #tpu.memory_space<vmem>>, vector<1x1x8x2xf32>
    %20 = vector.shape_cast %19 : vector<1x1x8x2xf32> to vector<8x2xf32>
    %21 = vector.shape_cast %18 : vector<8x2xf32> to vector<1x1x8x2xf32>
    tpu.vector_store %arg5[%c0_11, %c0_12, %c0_13, %c0_14], %21 {strides = array<i32>} : memref<1x1x8x2xf32, #tpu.memory_space<vmem>>, vector<1x1x8x2xf32>,
    return
  }
  func.func @transform_0(%arg0: i32, %arg1: i32) -> (i32, i32, i32) {
    %c0_i32 = arith.constant 0 : i32
    %c0_i32_0 = arith.constant 0 : i32
    %c0_i32_1 = arith.constant 0 : i32
    return %arg0, %c0_i32, %c0_i32_0 : i32, i32, i32
  }
  func.func @transform_1(%arg0: i32, %arg1: i32) -> (i32, i32, i32) {
    %c0_i32 = arith.constant 0 : i32
    %c0_i32_0 = arith.constant 0 : i32
    return %arg0, %c0_i32, %arg1 : i32, i32, i32
  }
  func.func @transform_2(%arg0: i32, %arg1: i32) -> (i32, i32, i32) {
    %c0_i32 = arith.constant 0 : i32
    %c0_i32_0 = arith.constant 0 : i32
    return %arg0, %c0_i32, %arg1 : i32, i32, i32
  }
  func.func @transform_3(%arg0: i32, %arg1: i32) -> (i32, i32, i32, i32) {
    %c0_i32 = arith.constant 0 : i32
    %c0_i32_0 = arith.constant 0 : i32
    %c0_i32_1 = arith.constant 0 : i32
    return %arg0, %arg1, %c0_i32, %c0_i32_0 : i32, i32, i32, i32
  }
}

module attributes {stable_mosaic.version = 11 : i64} {
  func.func @_norm_relu_kernel(%arg0: i32, %arg1: i32, %arg2: memref<1x8x512xbf16, #tpu.memory_space<vmem>>, %arg3: memref<8x1xf32, #tpu.memory_space<vmem>>, %arg4: memref<8x1xf32, #tpu.memory_space<vmem>>, %arg5: memref<1x8x512xbf16, #tpu.memory_space<vmem>>) attributes {dimension_semantics = [#tpu.dimension_semantics<parallel>, #tpu.dimension_semantics<parallel>], iteration_bounds = array<i64: 4, 1>, scalar_prefetch = 0 : i64, scratch_operands = 0 : i64, tpu.core_type = #tpu.core_type<tc>, window_params = [{transform_indices = @transform_0, window_bounds = array<i64: 1, 8, 512>}, {pipeline_mode = #tpu.pipeline_mode<synchronous>, transform_indices = @transform_1, window_bounds = array<i64: 8, 1>}, {pipeline_mode = #tpu.pipeline_mode<synchronous>, transform_indices = @transform_2, window_bounds = array<i64: 8, 1>}, {transform_indices = @transform_3, window_bounds = array<i64: 1, 8, 512>}]} {
    %c0 = arith.constant 0 : index
    %c0_0 = arith.constant 0 : index
    %c0_1 = arith.constant 0 : index
    %0 = vector.load %arg2[%c0, %c0_0, %c0_1] : memref<1x8x512xbf16, #tpu.memory_space<vmem>>, vector<1x8x512xbf16>
    %1 = vector.shape_cast %0 : vector<1x8x512xbf16> to vector<8x512xbf16>
    %2 = arith.extf %1 : vector<8x512xbf16> to vector<8x512xf32>
    %c0_2 = arith.constant 0 : index
    %c0_3 = arith.constant 0 : index
    %3 = vector.load %arg3[%c0_2, %c0_3] : memref<8x1xf32, #tpu.memory_space<vmem>>, vector<8x1xf32>
    %4 = vector.broadcast %3 : vector<8x1xf32> to vector<8x512xf32>
    %5 = arith.mulf %2, %4 : vector<8x512xf32>
    %c0_4 = arith.constant 0 : index
    %c0_5 = arith.constant 0 : index
    %6 = vector.load %arg4[%c0_4, %c0_5] : memref<8x1xf32, #tpu.memory_space<vmem>>, vector<8x1xf32>
    %7 = vector.broadcast %6 : vector<8x1xf32> to vector<8x512xf32>
    %8 = arith.addf %5, %7 : vector<8x512xf32>
    %cst = arith.constant 0.000000e+00 : f32
    %9 = vector.broadcast %cst : f32 to vector<8x512xf32>
    %10 = arith.maximumf %8, %9 : vector<8x512xf32>
    %11 = arith.truncf %10 : vector<8x512xf32> to vector<8x512xbf16>
    %c0_6 = arith.constant 0 : index
    %c0_7 = arith.constant 0 : index
    %c0_8 = arith.constant 0 : index
    %12 = vector.load %arg5[%c0_6, %c0_7, %c0_8] : memref<1x8x512xbf16, #tpu.memory_space<vmem>>, vector<1x8x512xbf16>
    %13 = vector.shape_cast %12 : vector<1x8x512xbf16> to vector<8x512xbf16>
    %14 = vector.shape_cast %11 : vector<8x512xbf16> to vector<1x8x512xbf16>
    tpu.vector_store %arg5[%c0_6, %c0_7, %c0_8], %14 {strides = array<i32>} : memref<1x8x512xbf16, #tpu.memory_space<vmem>>, vector<1x8x512xbf16>,
    return
  }
  func.func @transform_0(%arg0: i32, %arg1: i32) -> (i32, i32, i32) {
    %c0_i32 = arith.constant 0 : i32
    %c0_i32_0 = arith.constant 0 : i32
    return %arg0, %c0_i32, %arg1 : i32, i32, i32
  }
  func.func @transform_1(%arg0: i32, %arg1: i32) -> (i32, i32) {
    %c0_i32 = arith.constant 0 : i32
    %c0_i32_0 = arith.constant 0 : i32
    %c0_i32_1 = arith.constant 0 : i32
    return %c0_i32, %c0_i32_0 : i32, i32
  }
  func.func @transform_2(%arg0: i32, %arg1: i32) -> (i32, i32) {
    %c0_i32 = arith.constant 0 : i32
    %c0_i32_0 = arith.constant 0 : i32
    %c0_i32_1 = arith.constant 0 : i32
    return %c0_i32, %c0_i32_0 : i32, i32
  }
  func.func @transform_3(%arg0: i32, %arg1: i32) -> (i32, i32, i32) {
    %c0_i32 = arith.constant 0 : i32
    %c0_i32_0 = arith.constant 0 : i32
    return %arg0, %c0_i32, %arg1 : i32, i32, i32
  }
}

</mosaic_0001>

<bundles_post_ra>
// kernel: _lambda_.3
= control target key start
LH: loop header
LB: loop body
LE: loop exit
PB: predicated region body
PF: predicated region fallthrough
CT: control target
= control target key end

     0   :  { %s433_s12 = smov 0   ;;  %s435_s13 = smov 0   ;;  %s472_s0 = inlined_call_operand.vmem [shape: bf16[4,8,512], index: 0, kind: input, shape index: {}, may-alias: {0,3}]   ;;  %s473_s1 = inlined_call_operand.vmem [shape: f32[8,1], index: 1, kind: input, shape index: {}]   ;;  %s474_s2 = inlined_call_operand.vmem [shape: f32[8,1], index: 2, kind: input, shape index: {}]   ;;  %s475_s3 = inlined_call_operand.vmem [shape: bf16[4,8,512], index: 3, kind: output, shape index: {}, may-alias: {0,3}]  }
   0x1   :  { %s437_s14 = smov 0  }
   0x2 LB: > { %s25_s15 = sadd.s32 1, %s406_s13  ;;  %p349_p0 = scmp.ge.s32.totalorder %s410_s14, 1  ;;  %s410_s14 = sphi %s437_s14, %s13_s14   ;;  %s406_s13 = sphi %s435_s13, %s477_s13   ;;  %s402_s12 = sphi %s433_s12, %s476_s12  }
   0x3   : > { %p27_p1 = scmp.ge.s32.totalorder %s25_s15, 4  ;;  %p158_p2 = scmp.lt.s32.totalorder %s410_s14, 5 }
   0x5   : > { %s479_s15 = smov (%p27_p1, %s25_s15), 0  ;;  %p159_p3 = pnand %p349_p0, %p158_p2 }
   0x6   : > { %p191_p4 = scmp.lt.s32.totalorder (!%p159_p3), %s402_s12, 3 }
   0x7   : > { %162 = sbr.rel (%p159_p3) target bundleno = 149 (0x95), region = 32 }
   0xc   : > { %v216_v0 = vld [vmem:[%s473_s1] sm:$0xff]  ;;  %v412_v1 = vmov 0   ;;  %s481_s12 = smov (!%p191_p4, %s402_s12), 3 }
   0xd   : > { %387 = vset.pattern.permute.xlu0 %v412_v1  ;;  %v226_v2 = vld [vmem:[%s474_s2] sm:$0xff]  ;;  %s358_s20 = sshll.u32 %s481_s12, 4 }
   0xe   : > { %219 = vperm.xlu0 %387, %v216_v0   ;;  %s198_s23 = scalar_lea.vmem %s472_s0, %s358_s20  ;;  %s208_s26 = scalar_lea.vmem %s475_s3, %s358_s20 }
   0xf   : > { %v210_v3 = vld [vmem:[%s198_s23] sm:$0xff]  ;;  %v211_v4 = vld [vmem:[%s198_s23 + $0x8] sm:$0xff] }
  0x10   : > { %v212_v5 = vunpack.c.l.bf16 %v210_v3  ;;  %v213_v6 = vunpack.c.h.bf16 %v210_v3  ;;  %v214_v7 = vunpack.c.l.bf16 %v211_v4  ;;  %v215_v8 = vunpack.c.h.bf16 %v211_v4 }
  0x12   : > { %229 = vperm.xlu0 %387, %v226_v2  }
  0x89   : > { %v220_v9 = vpop.permute.xlu0 %219 }
  0x8a   : > { %v222_v10 = vmul.f32 %v220_v9, %v212_v5  ;;  %v223_v11 = vmul.f32 %v220_v9, %v213_v6  ;;  %v224_v12 = vmul.f32 %v220_v9, %v214_v7  ;;  %v225_v13 = vmul.f32 %v220_v9, %v215_v8 }
  0x8d   : > { %v230_v14 = vpop.permute.xlu0 %229 }
  0x8e   : > { %v232_v15 = vadd.f32 %v230_v14, %v222_v10  ;;  %v233_v16 = vadd.f32 %v230_v14, %v223_v11  ;;  %v234_v17 = vadd.f32 %v230_v14, %v224_v12  ;;  %v235_v18 = vadd.f32 %v230_v14, %v225_v13 }
  0x90   : > { %v236_v19 = vmax.f32 %v232_v15, 0.0  ;;  %v237_v20 = vmax.f32 %v233_v16, 0.0  ;;  %v238_v21 = vmax.f32 %v234_v17, 0.0  ;;  %v239_v22 = vmax.f32 %v235_v18, 0.0 }
  0x92   : > { %v360_v23 = vpack.c.bf16 %v237_v20, %v236_v19  ;;  %v361_v24 = vpack.c.bf16 %v239_v22, %v238_v21 }
  0x94   : > { %256 = vst [vmem:[%s208_s26] sm:$0xff] %v360_v23  ;;  %257 = vst [vmem:[%s208_s26 + $0x8] sm:$0xff] %v361_v24 }
  0x95 PF: > { %s13_s14 = sadd.s32 1, %s410_s14   ;;  %s476_s12 = smov %s406_s13 }
  0x96   : > { %p10_p5 = scmp.ge.s32.totalorder %s13_s14, 6   ;;  %s477_s13 = smov %s479_s15 }
  0x98   :  { %12 = sbr.rel (!%p10_p5) target bundleno = 2 (0x2), region = 62 }

// kernel: _lambda_.2
= control target key start
LH: loop header
LB: loop body
LE: loop exit
PB: predicated region body
PF: predicated region fallthrough
CT: control target
= control target key end

     0   :  { %s640_s12 = smov 0   ;;  %s642_s13 = smov 0   ;;  %s685_s0 = inlined_call_operand.vmem [shape: bf16[4,8,16], index: 0, kind: input, shape index: {}]   ;;  %s686_s1 = inlined_call_operand.vmem [shape: bf16[4,16,512], index: 1, kind: input, shape index: {}]   ;;  %s687_s2 = inlined_call_operand.vmem [shape: bf16[4,8,512], index: 2, kind: output, shape index: {0}]   ;;  %s688_s3 = inlined_call_operand.vmem [shape: f32[4,1,8,2], index: 3, kind: output, shape index: {1}]  }
   0x1   :  { %s644_s14 = smov 0  }
   0x2 LB: > { %s26_s15 = sadd.s32 1, %s613_s13  ;;  %p543_p0 = scmp.ge.s32.totalorder %s617_s14, 1  ;;  %s617_s14 = sphi %s644_s14, %s14_s14   ;;  %s613_s13 = sphi %s642_s13, %s690_s13   ;;  %s609_s12 = sphi %s640_s12, %s689_s12  }
   0x3   : > { %p28_p1 = scmp.ge.s32.totalorder %s26_s15, 4  ;;  %p172_p2 = scmp.lt.s32.totalorder %s617_s14, 5 }
   0x5   : > { %s692_s15 = smov (%p28_p1, %s26_s15), 0  ;;  %p173_p3 = pnand %p543_p0, %p172_p2 }
   0x6   : > { %p215_p4 = scmp.lt.s32.totalorder (!%p173_p3), %s609_s12, 3 }
   0x7   : > { %176 = sbr.rel (%p173_p3) target bundleno = 511 (0x1ff), region = 28 }
   0xc   : > { %v619_v0 = vmov 0   ;;  %s694_s12 = smov (!%p215_p4, %s609_s12), 3  ;;  %vm272_vm0 = vcmask 130048   ;;  %vm395_vm1 = vcmask 7168   ;;  %vm397_vm2 = vcmask 15360  }
   0xd   : > { %308 = vmatprep.mubr.bf16.mxu0 %v619_v0  ;;  %349 = vmatprep.mubr.bf16.mxu1 %v619_v0  ;;  %s560_s16 = sshll.u32 %s694_s12, 5  ;;  %s544_s17 = sshll.u32 %s694_s12, 2 }
   0xe   : > { %s227_s20 = scalar_lea.vmem %s686_s1, %s560_s16  ;;  %s218_s23 = scalar_lea.vmem %s685_s0, %s544_s17 }
   0xf   : > { %v589_v1 = vld [vmem:[%s227_s20 + $0x4] ss:$16 sps:$4 sm:$0xff]   ;;  %v591_v2 = vld [vmem:[%s227_s20 + $0xc] ss:$16 sps:$4 sm:$0xff]   ;;  %v593_v3 = vld [vmem:[%s227_s20] ss:$16 sps:$4 sm:$0xff]  }
  0x10   : > { %290 = vmatprep.subr.bf16.mxu0 %v589_v1  ;;  %v594_v4 = vld [vmem:[%s227_s20 + $0x8] ss:$16 sps:$4 sm:$0xff]   ;;  %331 = vmatprep.subr.bf16.mxu1 %v591_v2  ;;  %v247_v5 = vld [vmem:[%s218_s23] sm:$0xf]  ;;  %s561_s24 = sshll.u32 %s694_s12, 4  ;;  %s549_s28 = sshll.u32 %s694_s12, 3 }
  0x11   : > { %291 = vmatpush1.bf16.msra.mxu0 %v593_v3  ;;  %332 = vmatpush1.bf16.msra.mxu1 %v594_v4  ;;  %s237_s27 = scalar_lea.vmem %s687_s2, %s561_s24  ;;  %s245_s4 = scalar_lea.vmem %s688_s3, %s549_s28 }
  0x14   : > { %554 = vmatmul.mubr.msk.bf16.vlgmr.msra.gmra.mxu0 %vm272_vm0, %v247_v5  ;;  %555 = vmatmul.mubr.msk.bf16.vlgmr.msra.gmra.mxu1 %vm272_vm0, %v247_v5 }
  0xd4   : > { %v310_v6 = vpop.f32.mrf.mxu0  ;;  %v351_v7 = vpop.f32.mrf.mxu1 }
  0xd6   : > { %v312_v8 = vpop.f32.mrf.mxu0  ;;  %v353_v9 = vpop.f32.mrf.mxu1 }
  0xd7   : > { %v562_v10 = vpack.c.bf16 %v312_v8, %v310_v6  ;;  %v376_v11 = vadd.f32 %v312_v8, %v310_v6  ;;  %v563_v12 = vpack.c.bf16 %v353_v9, %v351_v7 }
  0xd8   : > { %v314_v13 = vpop.f32.mrf.mxu0  ;;  %v355_v14 = vpop.f32.mrf.mxu1 }
  0xd9   : > { %374 = vst [vmem:[%s237_s27] sm:$0xff] %v562_v10  ;;  %375 = vst [vmem:[%s237_s27 + $0x8] sm:$0xff] %v563_v12  ;;  %v377_v15 = vadd.f32 %v376_v11, %v351_v7 }
  0xda   : > { %v315_v16 = vpop.f32.mrf.mxu0  ;;  %v356_v17 = vpop.f32.mrf.mxu1 }
  0xdb   : > { %v378_v18 = vadd.f32 %v377_v15, %v353_v9 }
  0xdd   : > { %379 = vadd.xlane.f32.xlu0 %v378_v18 }
 0x166   : > { %v380_v19 = vpop.xlane.xlu0 %379 }
 0x167   : > { %v381_v20 = vmul.f32 0.001953125, %v380_v19 }
 0x169   : > { %v382_v21 = vsub.f32 %v310_v6, %v381_v20  ;;  %v383_v22 = vsub.f32 %v312_v8, %v381_v20  ;;  %v384_v23 = vsub.f32 %v351_v7, %v381_v20  ;;  %v385_v24 = vsub.f32 %v353_v9, %v381_v20 }
 0x16b   : > { %v386_v25 = vmul.f32 %v382_v21, %v382_v21  ;;  %v387_v26 = vmul.f32 %v383_v22, %v383_v22  ;;  %v388_v27 = vmul.f32 %v384_v23, %v384_v23  ;;  %v389_v29 = vmul.f32 %v385_v24, %v385_v24 }
 0x16d   : > { %v390_v28 = vadd.f32 %v387_v26, %v386_v25 }
 0x16f   : > { %v391_v30 = vadd.f32 %v390_v28, %v388_v27 }
 0x171   : > { %v392_v31 = vadd.f32 %v391_v30, %v389_v29 }
 0x173   : > { %393 = vadd.xlane.f32.xlu0 %v392_v31 }
 0x1fc   : > { %v394_v32 = vpop.xlane.xlu0 %393 }
 0x1fd   : > { %v396_v33 = vsel %vm395_vm1, %v381_v20, %v394_v32 }
 0x1fe   : > { %398 = vst.msk [vmem:[%s245_s4] sm:$0xff] %vm397_vm2, %v396_v33 }
 0x1ff PF: > { %s14_s14 = sadd.s32 1, %s617_s14   ;;  %s689_s12 = smov %s613_s13 }
 0x200   : > { %p11_p5 = scmp.ge.s32.totalorder %s14_s14, 6   ;;  %s690_s13 = smov %s692_s15 }
 0x202   :  { %13 = sbr.rel (!%p11_p5) target bundleno = 2 (0x2), region = 73 }

</bundles_post_ra>
